<compile_context>
chip_gen: v5e
topology: v5e:2x2
jax: 0.10.0
libtpu: 0.0.40
codegen_flags: <defaults>
</compile_context>

<pallas_src>
import jax
import jax.numpy as jnp
from jax.experimental import pallas as pl
from jax.experimental.pallas import tpu as pltpu


def _round_up(a, b):
    return ((a + b - 1) // b) * b


def _block_diag(w, reps):
    """block_diag(w, w, ..., w) with `reps` copies; (k, n) -> (reps*k, reps*n)."""
    if reps == 1:
        return w
    k, n = w.shape
    out = jnp.zeros((reps * k, reps * n), w.dtype)
    for i in range(reps):
        out = out.at[i * k:(i + 1) * k, i * n:(i + 1) * n].set(w)
    return out


def film_kernel(u_ref, x_ref, w1_ref, b1_ref, w2g_ref, b2g_ref, w2b_ref, b2b_ref, o_ref):
    # MLP layer 1 (MXU) + ReLU.
    h = jnp.dot(u_ref[...], w1_ref[...], preferred_element_type=jnp.float32)
    h = jnp.maximum(h + b1_ref[...], 0.0)
    # MLP layer 2, gamma and beta halves computed with pre-split weights so there is
    # no sub-128-lane slicing inside the kernel.
    gammas = jnp.dot(h, w2g_ref[...], preferred_element_type=jnp.float32) + b2g_ref[...]
    betas = jnp.dot(h, w2b_ref[...], preferred_element_type=jnp.float32) + b2b_ref[...]
    # FiLM modulation (VPU), lane-dense (last dim is 128 when hidden | 128).
    o_ref[...] = (gammas * x_ref[...].astype(jnp.float32) + betas).astype(o_ref.dtype)


def film_forward(x, u, w1, b1, w2, b2, *, tile_rows=2048):
    """x: (B, N, hidden), u: (B, N, in_features) -> (B, N, hidden)."""
    B, N, hidden = x.shape
    in_features = u.shape[-1]
    film_hidden = w1.shape[1]
    assert w2.shape == (film_hidden, 2 * hidden)

    # Wrapper-side gamma/beta weight split (free in XLA).
    w2g, w2b = w2[:, :hidden], w2[:, hidden:]
    b2g, b2b = b2[:hidden], b2[hidden:]

    # Lane packing factor: pack `pack` consecutive rows into one 128-lane row so the
    # output store path is unmasked.  Falls back to 1 if hidden doesn't divide 128.
    if hidden < 128 and 128 % hidden == 0:
        pack = 128 // hidden
    else:
        pack = 1

    align = 8 * pack  # packed tile rows must be a multiple of 8 sublanes
    M = B * N

    # Adaptive tile size: big for large M, shrunk (but aligned) for tiny inputs.
    row_tile = max(align, min(_round_up(tile_rows, align), _round_up(M, align)))
    M_pad = _round_up(M, row_tile)

    x2 = x.reshape(M, hidden)
    u2 = u.reshape(M, in_features)
    if M_pad != M:
        x2 = jnp.pad(x2, ((0, M_pad - M), (0, 0)))
        u2 = jnp.pad(u2, ((0, M_pad - M), (0, 0)))

    # Row packing (pure row-major reshape; no data movement beyond what XLA fuses).
    Mp = M_pad // pack
    xp = x2.reshape(Mp, pack * hidden)
    up = u2.reshape(Mp, pack * in_features)

    # Block-diagonal weight replication so the packed matmuls act independently on
    # each 32-lane group (mathematically identical to the unpacked computation).
    w1p = _block_diag(w1, pack)                                   # (p*in, p*fh)
    w2gp = _block_diag(w2g, pack)                                 # (p*fh, p*hidden)
    w2bp = _block_diag(w2b, pack)
    b1p = jnp.tile(b1, pack).reshape(1, pack * film_hidden)
    b2gp = jnp.tile(b2g, pack).reshape(1, pack * hidden)
    b2bp = jnp.tile(b2b, pack).reshape(1, pack * hidden)

    pt = row_tile // pack          # packed rows per tile (multiple of 8)
    grid = (Mp // pt,)

    cin = pack * in_features
    cfh = pack * film_hidden
    ch = pack * hidden

    yp = pl.pallas_call(
        film_kernel,
        out_shape=jax.ShapeDtypeStruct((Mp, ch), x.dtype),
        grid_spec=pltpu.PrefetchScalarGridSpec(
            num_scalar_prefetch=0,
            grid=grid,
            in_specs=[
                pl.BlockSpec((pt, cin), lambda i: (i, 0)),   # u rows (packed)
                pl.BlockSpec((pt, ch), lambda i: (i, 0)),    # x rows (packed, 128-lane dense)
                # Weights/biases: constant block index -> resident across the grid
                # (Pallas skips re-DMA for unchanged blocks); tiny VMEM footprint.
                pl.BlockSpec((cin, cfh), lambda i: (0, 0)),  # W1 (block-diag packed)
                pl.BlockSpec((1, cfh), lambda i: (0, 0)),    # b1
                pl.BlockSpec((cfh, ch), lambda i: (0, 0)),   # W2 gamma half
                pl.BlockSpec((1, ch), lambda i: (0, 0)),     # b2 gamma half
                pl.BlockSpec((cfh, ch), lambda i: (0, 0)),   # W2 beta half
                pl.BlockSpec((1, ch), lambda i: (0, 0)),     # b2 beta half
            ],
            out_specs=pl.BlockSpec((pt, ch), lambda i: (i, 0)),
        ),
        compiler_params=pltpu.CompilerParams(
            dimension_semantics=("parallel",),  # single row axis; shards across v7x TCs
        ),
    )(up, xp, w1p, b1p, w2gp, b2gp, w2bp, b2bp)

    y = yp.reshape(M_pad, hidden)[:M]
    return y.reshape(B, N, hidden)


def film_reference(x, u, w1, b1, w2, b2):
    h = jnp.maximum(u @ w1 + b1, 0.0)
    out = h @ w2 + b2
    hidden = x.shape[-1]
    gammas, betas = out[..., :hidden], out[..., hidden:]
    return gammas * x + betas


if __name__ == "__main__":
    # Shapes consistent with the module:
    #   in_features=8, film_dims=[32], hidden_dim=32  -> MLP [8, 32, 64]
    #   x: (B, N, hidden_dim), u: (B, N, in_features)
    in_features, film_hidden, hidden_dim = 8, 32, 32

    key = jax.random.PRNGKey(0)
    kx, ku, kw1, kb1, kw2, kb2 = jax.random.split(key, 6)

    # Deterministic synthetic parameters (not a checkpoint).
    w1 = jax.random.normal(kw1, (in_features, film_hidden), dtype=jnp.float32) * 0.1
    b1 = jax.random.normal(kb1, (film_hidden,), dtype=jnp.float32) * 0.1
    w2 = jax.random.normal(kw2, (film_hidden, 2 * hidden_dim), dtype=jnp.float32) * 0.1
    b2 = jax.random.normal(kb2, (2 * hidden_dim,), dtype=jnp.float32) * 0.1

    ok = True
    for (B, N) in [(2, 16), (3, 10)]:  # second case exercises the padding path (M=30)
        kxx, kuu = jax.random.split(jax.random.fold_in(key, B * 100 + N), 2)
        x = jax.random.normal(kxx, (B, N, hidden_dim), dtype=jnp.float32)
        u = jax.random.normal(kuu, (B, N, in_features), dtype=jnp.float32)

        y = film_forward(x, u, w1, b1, w2, b2)
        y = jax.block_until_ready(y)

        y_ref = film_reference(x, u, w1, b1, w2, b2)
        ok = ok and bool(jnp.allclose(y, y_ref, atol=1e-5, rtol=1e-5))

    assert ok, "mismatch vs reference"
    print("KERNEL_OK")
</pallas_src>

<mosaic_0001>
module attributes {stable_mosaic.version = 11 : i64} {
  func.func @film_kernel(%arg0: i32, %arg1: memref<8x32xf32, #tpu.memory_space<vmem>>, %arg2: memref<8x128xf32, #tpu.memory_space<vmem>>, %arg3: memref<32x128xf32, #tpu.memory_space<vmem>>, %arg4: memref<1x128xf32, #tpu.memory_space<vmem>>, %arg5: memref<128x128xf32, #tpu.memory_space<vmem>>, %arg6: memref<1x128xf32, #tpu.memory_space<vmem>>, %arg7: memref<128x128xf32, #tpu.memory_space<vmem>>, %arg8: memref<1x128xf32, #tpu.memory_space<vmem>>, %arg9: memref<8x128xf32, #tpu.memory_space<vmem>>) attributes {dimension_semantics = [#tpu.dimension_semantics<parallel>], iteration_bounds = array<i64: 1>, scalar_prefetch = 0 : i64, scratch_operands = 0 : i64, tpu.core_type = #tpu.core_type<tc>, window_params = [{transform_indices = @transform_0, window_bounds = array<i64: 8, 32>}, {transform_indices = @transform_1, window_bounds = array<i64: 8, 128>}, {pipeline_mode = #tpu.pipeline_mode<synchronous>, transform_indices = @transform_2, window_bounds = array<i64: 32, 128>}, {pipeline_mode = #tpu.pipeline_mode<synchronous>, transform_indices = @transform_3, window_bounds = array<i64: 1, 128>}, {pipeline_mode = #tpu.pipeline_mode<synchronous>, transform_indices = @transform_4, window_bounds = array<i64: 128, 128>}, {pipeline_mode = #tpu.pipeline_mode<synchronous>, transform_indices = @transform_5, window_bounds = array<i64: 1, 128>}, {pipeline_mode = #tpu.pipeline_mode<synchronous>, transform_indices = @transform_6, window_bounds = array<i64: 128, 128>}, {pipeline_mode = #tpu.pipeline_mode<synchronous>, transform_indices = @transform_7, window_bounds = array<i64: 1, 128>}, {transform_indices = @transform_8, window_bounds = array<i64: 8, 128>}]} {
    %c0 = arith.constant 0 : index
    %c0_0 = arith.constant 0 : index
    %0 = vector.load %arg1[%c0, %c0_0] : memref<8x32xf32, #tpu.memory_space<vmem>>, vector<8x32xf32>
    %c0_1 = arith.constant 0 : index
    %c0_2 = arith.constant 0 : index
    %1 = vector.load %arg3[%c0_1, %c0_2] : memref<32x128xf32, #tpu.memory_space<vmem>>, vector<32x128xf32>
    %cst = arith.constant dense<0.000000e+00> : vector<8x128xf32>
    %2 = tpu.matmul %0, %1, %cst {dimension_numbers = #tpu.dot_dimension_numbers<[1], [0], [0], [1], [0, 0, 1, 1], [], []>} : vector<8x32xf32>, vector<32x128xf32>, vector<8x128xf32> -> vector<8x128xf32>
    %c0_3 = arith.constant 0 : index
    %c0_4 = arith.constant 0 : index
    %3 = vector.load %arg4[%c0_3, %c0_4] : memref<1x128xf32, #tpu.memory_space<vmem>>, vector<1x128xf32>
    %4 = vector.broadcast %3 : vector<1x128xf32> to vector<8x128xf32>
    %5 = arith.addf %2, %4 : vector<8x128xf32>
    %cst_5 = arith.constant 0.000000e+00 : f32
    %6 = vector.broadcast %cst_5 : f32 to vector<8x128xf32>
    %7 = arith.maximumf %5, %6 : vector<8x128xf32>
    %c0_6 = arith.constant 0 : index
    %c0_7 = arith.constant 0 : index
    %8 = vector.load %arg5[%c0_6, %c0_7] : memref<128x128xf32, #tpu.memory_space<vmem>>, vector<128x128xf32>
    %cst_8 = arith.constant dense<0.000000e+00> : vector<8x128xf32>
    %9 = tpu.matmul %7, %8, %cst_8 {dimension_numbers = #tpu.dot_dimension_numbers<[1], [0], [0], [1], [0, 0, 1, 1], [], []>} : vector<8x128xf32>, vector<128x128xf32>, vector<8x128xf32> -> vector<8x128xf32>
    %c0_9 = arith.constant 0 : index
    %c0_10 = arith.constant 0 : index
    %10 = vector.load %arg6[%c0_9, %c0_10] : memref<1x128xf32, #tpu.memory_space<vmem>>, vector<1x128xf32>
    %11 = vector.broadcast %10 : vector<1x128xf32> to vector<8x128xf32>
    %12 = arith.addf %9, %11 : vector<8x128xf32>
    %c0_11 = arith.constant 0 : index
    %c0_12 = arith.constant 0 : index
    %13 = vector.load %arg7[%c0_11, %c0_12] : memref<128x128xf32, #tpu.memory_space<vmem>>, vector<128x128xf32>
    %cst_13 = arith.constant dense<0.000000e+00> : vector<8x128xf32>
    %14 = tpu.matmul %7, %13, %cst_13 {dimension_numbers = #tpu.dot_dimension_numbers<[1], [0], [0], [1], [0, 0, 1, 1], [], []>} : vector<8x128xf32>, vector<128x128xf32>, vector<8x128xf32> -> vector<8x128xf32>
    %c0_14 = arith.constant 0 : index
    %c0_15 = arith.constant 0 : index
    %15 = vector.load %arg8[%c0_14, %c0_15] : memref<1x128xf32, #tpu.memory_space<vmem>>, vector<1x128xf32>
    %16 = vector.broadcast %15 : vector<1x128xf32> to vector<8x128xf32>
    %17 = arith.addf %14, %16 : vector<8x128xf32>
    %c0_16 = arith.constant 0 : index
    %c0_17 = arith.constant 0 : index
    %18 = vector.load %arg2[%c0_16, %c0_17] : memref<8x128xf32, #tpu.memory_space<vmem>>, vector<8x128xf32>
    %19 = arith.mulf %12, %18 : vector<8x128xf32>
    %20 = arith.addf %19, %17 : vector<8x128xf32>
    %c0_18 = arith.constant 0 : index
    %c0_19 = arith.constant 0 : index
    %21 = vector.load %arg9[%c0_18, %c0_19] : memref<8x128xf32, #tpu.memory_space<vmem>>, vector<8x128xf32>
    tpu.vector_store %arg9[%c0_18, %c0_19], %20 {strides = array<i32>} : memref<8x128xf32, #tpu.memory_space<vmem>>, vector<8x128xf32>,
    return
  }
  func.func @transform_0(%arg0: i32) -> (i32, i32) {
    %c0_i32 = arith.constant 0 : i32
    %c0_i32_0 = arith.constant 0 : i32
    return %arg0, %c0_i32 : i32, i32
  }
  func.func @transform_1(%arg0: i32) -> (i32, i32) {
    %c0_i32 = arith.constant 0 : i32
    %c0_i32_0 = arith.constant 0 : i32
    return %arg0, %c0_i32 : i32, i32
  }
  func.func @transform_2(%arg0: i32) -> (i32, i32) {
    %c0_i32 = arith.constant 0 : i32
    %c0_i32_0 = arith.constant 0 : i32
    %c0_i32_1 = arith.constant 0 : i32
    return %c0_i32, %c0_i32_0 : i32, i32
  }
  func.func @transform_3(%arg0: i32) -> (i32, i32) {
    %c0_i32 = arith.constant 0 : i32
    %c0_i32_0 = arith.constant 0 : i32
    %c0_i32_1 = arith.constant 0 : i32
    return %c0_i32, %c0_i32_0 : i32, i32
  }
  func.func @transform_4(%arg0: i32) -> (i32, i32) {
    %c0_i32 = arith.constant 0 : i32
    %c0_i32_0 = arith.constant 0 : i32
    %c0_i32_1 = arith.constant 0 : i32
    return %c0_i32, %c0_i32_0 : i32, i32
  }
  func.func @transform_5(%arg0: i32) -> (i32, i32) {
    %c0_i32 = arith.constant 0 : i32
    %c0_i32_0 = arith.constant 0 : i32
    %c0_i32_1 = arith.constant 0 : i32
    return %c0_i32, %c0_i32_0 : i32, i32
  }
  func.func @transform_6(%arg0: i32) -> (i32, i32) {
    %c0_i32 = arith.constant 0 : i32
    %c0_i32_0 = arith.constant 0 : i32
    %c0_i32_1 = arith.constant 0 : i32
    return %c0_i32, %c0_i32_0 : i32, i32
  }
  func.func @transform_7(%arg0: i32) -> (i32, i32) {
    %c0_i32 = arith.constant 0 : i32
    %c0_i32_0 = arith.constant 0 : i32
    %c0_i32_1 = arith.constant 0 : i32
    return %c0_i32, %c0_i32_0 : i32, i32
  }
  func.func @transform_8(%arg0: i32) -> (i32, i32) {
    %c0_i32 = arith.constant 0 : i32
    %c0_i32_0 = arith.constant 0 : i32
    return %arg0, %c0_i32 : i32, i32
  }
}

</mosaic_0001>

<bundles_post_ra>
// kernel: tpu_custom_call.1
= control target key start
LH: loop header
LB: loop body
LE: loop exit
PB: predicated region body
PF: predicated region fallthrough
CT: control target
= control target key end

     0   :  { %13 = vsyncpa [#allocation3], 0  ;;  %s485_s0 = inlined_call_operand.hbm [shape: f32[8,32], index: 0, kind: input, shape index: {}]   ;;  %s486_s1 = inlined_call_operand.hbm [shape: f32[8,128], index: 1, kind: input, shape index: {}]   ;;  %s487_s2 = inlined_call_operand.hbm [shape: f32[32,128], index: 2, kind: input, shape index: {}]   ;;  %s488_s3 = inlined_call_operand.vmem [shape: f32[1,128], index: 3, kind: input, shape index: {}]   ;;  %s489_s4 = inlined_call_operand.hbm [shape: f32[128,128], index: 4, kind: input, shape index: {}]   ;;  %s490_s5 = inlined_call_operand.vmem [shape: f32[1,128], index: 5, kind: input, shape index: {}]   ;;  %s491_s6 = inlined_call_operand.hbm [shape: f32[128,128], index: 6, kind: input, shape index: {}]   ;;  %s492_s7 = inlined_call_operand.vmem [shape: f32[1,128], index: 7, kind: input, shape index: {}]   ;;  %s493_s8 = inlined_call_operand.hbm [shape: f32[8,128], index: 8, kind: output, shape index: {}]  }
   0x1   :  { %14 = vsyncpa [#allocation6], 0 }
   0x2   :  { %15 = vsyncpa [#allocation9], 0  ;;  %s33_s29 = sshll.u32 %s486_s1, 4  ;;  %s34_s29 = int_to_ptr.hbm [resolvable:$true] %s33_s29 }
   0x3   :  { %16 = vsyncpa [#allocation4], 0  ;;  %s405_s30 = smov [#allocation5]   ;;  %s58_s12 = sshll.u32 %s489_s4, 4  ;;  %s59_s12 = int_to_ptr.hbm [resolvable:$true] %s58_s12 }
   0x4   :  { %s35_s9 = sshll.u32 %s405_s30, 4  ;;  %s406_s13 = smov [#allocation8]   ;;  %s36_s9 = int_to_ptr.vmem [resolvable:$true] %s35_s9 }
   0x5   :  { %38 = dma.hbm_to_vmem [thread:$0]  %s34_s29, 128, %s36_s9, [#allocation6]  }
   0x6   :  { %s60_s14 = sshll.u32 %s406_s13, 4  ;;  %s22_s17 = sshll.u32 %s485_s0, 4  ;;  %s61_s14 = int_to_ptr.vmem [resolvable:$true] %s60_s14  ;;  %s23_s17 = int_to_ptr.hbm [resolvable:$true] %s22_s17 }
   0x7   :  { %s407_s1 = smov 128   ;;  %s408_s18 = smov 8  }
   0x8   :  { %66 = dma.hbm_to_vmem [thread:$0]  %s59_s12, 2048, %s61_s14, [#allocation9], %s407_s1, %s407_s1, %s408_s18  }
   0x9   :  { %s43_s21 = sshll.u32 %s487_s2, 4  ;;  %s409_s22 = smov [#allocation2]   ;;  %s44_s21 = int_to_ptr.hbm [resolvable:$true] %s43_s21 }
   0xa   :  { %s24_s23 = sshll.u32 %s409_s22, 4  ;;  %s410_s4 = smov [#allocation7]   ;;  %s25_s23 = int_to_ptr.vmem [resolvable:$true] %s24_s23 }
   0xb   :  { %27 = dma.hbm_to_vmem [thread:$0]  %s23_s17, 128, %s25_s23, [#allocation3]  }
   0xc   :  { %s45_s24 = sshll.u32 %s410_s4, 4  ;;  %s73_s0 = sshll.u32 %s491_s6, 4  ;;  %s46_s24 = int_to_ptr.vmem [resolvable:$true] %s45_s24  ;;  %s74_s0 = int_to_ptr.hbm [resolvable:$true] %s73_s0 }
   0xd   :  { %51 = dma.hbm_to_vmem [thread:$0]  %s44_s21, 512, %s46_s24, [#allocation6], %s407_s1, %s407_s1, %s408_s18  }
   0xe   :  { %s411_s27 = smov [#allocation10]  }
   0xf   :  { %s75_s28 = sshll.u32 %s411_s27, 4  ;;  %s76_s28 = int_to_ptr.vmem [resolvable:$true] %s75_s28 }
  0x10   :  { %81 = dma.hbm_to_vmem [thread:$0]  %s74_s0, 2048, %s76_s28, [#allocation9], %s407_s1, %s407_s1, %s408_s18  }
  0x11   :  { %397 = dma.done.wait [#allocation3], 128  }
  0x12   :  { %398 = vsyncadd [#allocation3], 4294967168 }
  0x13   :  { %399 = dma.done.wait [#allocation6], 640  }
  0x14   :  { %400 = vsyncadd [#allocation6], 4294966656 }
  0x15   :  { %401 = dma.done.wait [#allocation9], 4096  }
  0x16   :  { %402 = vsyncadd [#allocation9], 4294963200  ;;  %v108_v0 = vld [vmem:[#allocation7 + $0x18] sm:$0xff]  ;;  %v107_v1 = vld [vmem:[#allocation7 + $0x10] sm:$0xff]  ;;  %vm113_vm0 = vcmask 261120   ;;  %s412_s11 = smov [#allocation11]  }
  0x17   :  { %129 = vmatpush.msra.mxu0 %v108_v0  ;;  %v106_v2 = vld [vmem:[#allocation7 + $0x8] sm:$0xff]  ;;  %v153_v3 = vld [vmem:[#allocation8 + $0x78] sm:$0xff]  ;;  %v152_v5 = vld [vmem:[#allocation8 + $0x70] sm:$0xff]  ;;  %s227_s12 = sshll.u32 %s412_s11, 4  ;;  %s229_s14 = sshll.u32 %s493_s8, 4  ;;  %s228_s12 = int_to_ptr.vmem [resolvable:$true] %s227_s12  ;;  %s230_s14 = int_to_ptr.hbm [resolvable:$true] %s229_s14 }
  0x18   :  { %158 = vmatpush.msra.mxu1 %v153_v3  ;;  %v193_v4 = vld [vmem:[#allocation10 + $0x78] sm:$0xff]  ;;  %v192_v6 = vld [vmem:[#allocation10 + $0x70] sm:$0xff]  ;;  %v151_v7 = vld [vmem:[#allocation8 + $0x68] sm:$0xff] }
  0x19   :  { %130 = vmatpush.msra.mxu0 %v107_v1  ;;  %198 = vmatpush.msra.mxu2 %v193_v4  ;;  %v105_v8 = vld [vmem:[#allocation7] sm:$0xff]  ;;  %v191_v9 = vld [vmem:[#allocation10 + $0x68] sm:$0xff]  ;;  %v104_v10 = vld [vmem:[#allocation2] sm:$0xff] }
  0x1a   :  { %159 = vmatpush.msra.mxu1 %v152_v5  ;;  %v150_v11 = vld [vmem:[#allocation8 + $0x60] sm:$0xff]  ;;  %v149_v13 = vld [vmem:[#allocation8 + $0x58] sm:$0xff]  ;;  %v148_v15 = vld [vmem:[#allocation8 + $0x50] sm:$0xff] }
  0x1b   :  { %131 = vmatpush.msra.mxu0 %v106_v2  ;;  %199 = vmatpush.msra.mxu2 %v192_v6  ;;  %v190_v12 = vld [vmem:[#allocation10 + $0x60] sm:$0xff]  ;;  %v189_v14 = vld [vmem:[#allocation10 + $0x58] sm:$0xff]  ;;  %v188_v16 = vld [vmem:[#allocation10 + $0x50] sm:$0xff] }
  0x1c   :  { %160 = vmatpush.msra.mxu1 %v151_v7  ;;  %v147_v17 = vld [vmem:[#allocation8 + $0x48] sm:$0xff]  ;;  %v146_v19 = vld [vmem:[#allocation8 + $0x40] sm:$0xff]  ;;  %v145_v21 = vld [vmem:[#allocation8 + $0x38] sm:$0xff] }
  0x1d   :  { %132 = vmatpush.msra.mxu0 %v105_v8  ;;  %200 = vmatpush.msra.mxu2 %v191_v9  ;;  %v187_v18 = vld [vmem:[#allocation10 + $0x48] sm:$0xff]  ;;  %v186_v20 = vld [vmem:[#allocation10 + $0x40] sm:$0xff]  ;;  %v185_v22 = vld [vmem:[#allocation10 + $0x38] sm:$0xff] }
  0x1e   :  { %241 = vmatmul.msk.f32.vlgmr.msra.gmra.mxu0 %vm113_vm0, %v104_v10  ;;  %161 = vmatpush.msra.mxu1 %v150_v11  ;;  %v144_v23 = vld [vmem:[#allocation8 + $0x30] sm:$0xff]  ;;  %v143_v25 = vld [vmem:[#allocation8 + $0x28] sm:$0xff]  ;;  %v142_v27 = vld [vmem:[#allocation8 + $0x20] sm:$0xff] }
  0x1f   :  { %201 = vmatpush.msra.mxu2 %v190_v12  ;;  %v184_v24 = vld [vmem:[#allocation10 + $0x30] sm:$0xff]  ;;  %v183_v26 = vld [vmem:[#allocation10 + $0x28] sm:$0xff]  ;;  %v182_v28 = vld [vmem:[#allocation10 + $0x20] sm:$0xff] }
  0x20   :  { %162 = vmatpush.msra.mxu1 %v149_v13  ;;  %v141_v29 = vld [vmem:[#allocation8 + $0x18] sm:$0xff]  ;;  %v140_v31 = vld [vmem:[#allocation8 + $0x10] sm:$0xff]  ;;  %v139_v33 = vld [vmem:[#allocation8 + $0x8] sm:$0xff] }
  0x21   :  { %202 = vmatpush.msra.mxu2 %v189_v14  ;;  %v181_v30 = vld [vmem:[#allocation10 + $0x18] sm:$0xff]  ;;  %v180_v32 = vld [vmem:[#allocation10 + $0x10] sm:$0xff]  ;;  %v179_v34 = vld [vmem:[#allocation10 + $0x8] sm:$0xff] }
  0x22   :  { %163 = vmatpush.msra.mxu1 %v148_v15  ;;  %v138_v35 = vld [vmem:[#allocation8] sm:$0xff]  ;;  %v250_v37 = vld [vmem:[%s488_s3] ss:$0 sm:$0xff]  ;;  %v218_v45 = vld [vmem:[#allocation5] sm:$0xff] }
  0x23   :  { %203 = vmatpush.msra.mxu2 %v188_v16  ;;  %v178_v36 = vld [vmem:[#allocation10] sm:$0xff]  ;;  %v251_v41 = vld [vmem:[%s490_s5] ss:$0 sm:$0xff] }
  0x24   :  { %164 = vmatpush.msra.mxu1 %v147_v17  ;;  %v252_v44 = vld [vmem:[%s492_s7] ss:$0 sm:$0xff] }
  0x25   :  { %204 = vmatpush.msra.mxu2 %v187_v18 }
  0x26   :  { %165 = vmatpush.msra.mxu1 %v146_v19 }
  0x27   :  { %205 = vmatpush.msra.mxu2 %v186_v20 }
  0x28   :  { %166 = vmatpush.msra.mxu1 %v145_v21 }
  0x29   :  { %206 = vmatpush.msra.mxu2 %v185_v22 }
  0x2a   :  { %167 = vmatpush.msra.mxu1 %v144_v23 }
  0x2b   :  { %207 = vmatpush.msra.mxu2 %v184_v24 }
  0x2c   :  { %168 = vmatpush.msra.mxu1 %v143_v25 }
  0x2d   :  { %208 = vmatpush.msra.mxu2 %v183_v26 }
  0x2e   :  { %169 = vmatpush.msra.mxu1 %v142_v27 }
  0x2f   :  { %209 = vmatpush.msra.mxu2 %v182_v28 }
  0x30   :  { %170 = vmatpush.msra.mxu1 %v141_v29 }
  0x31   :  { %210 = vmatpush.msra.mxu2 %v181_v30 }
  0x32   :  { %171 = vmatpush.msra.mxu1 %v140_v31 }
  0x33   :  { %211 = vmatpush.msra.mxu2 %v180_v32 }
  0x34   :  { %172 = vmatpush.msra.mxu1 %v139_v33 }
  0x35   :  { %212 = vmatpush.msra.mxu2 %v179_v34 }
  0x36   :  { %173 = vmatpush.msra.mxu1 %v138_v35 }
  0x37   :  { %213 = vmatpush.msra.mxu2 %v178_v36 }
  0x9b   :  { %v134_v38 = vpop.f32.mrf.mxu0 }
  0x9c   :  { %v135_v39 = vadd.f32 %v250_v37, %v134_v38 }
  0x9e   :  { %v137_v40 = vmax.f32 %v135_v39, 0.0 }
  0xa0   :  { %174 = vmatmul.f32.vlgmr.msra.gmra.mxu1 %v137_v40  ;;  %214 = vmatmul.f32.vlgmr.msra.gmra.mxu2 %v137_v40 }
 0x11d   :  { %v175_v42 = vpop.f32.mrf.mxu1 }
 0x11e   :  { %v176_v43 = vadd.f32 %v251_v41, %v175_v42 }
 0x120   :  { %v219_v47 = vmul.f32 %v218_v45, %v176_v43 }
 0x123   :  { %v215_v46 = vpop.f32.mrf.mxu2 }
 0x124   :  { %v216_v48 = vadd.f32 %v252_v44, %v215_v46 }
 0x126   :  { %v220_v49 = vadd.f32 %v219_v47, %v216_v48 }
 0x128   :  { %221 = vst [vmem:[#allocation11] sm:$0xff] %v220_v49 }
 0x129   :  { %232 = dma.vmem_to_hbm [thread:$0]  %s228_s12, 128, %s230_s14, [#allocation4]  }
 0x12a   :  { %403 = dma.done.wait [#allocation4], 128  }
 0x12b   :  { %404 = vsyncadd [#allocation4], 4294967168 }
 0x12c   :  { %237 = vsyncpa [#allocation3], 1 }
 0x12d   :  { %238 = vsyncpa [#allocation6], 1 }
 0x12e   :  { %239 = vsyncpa [#allocation9], 1 }
 0x12f   :  { %240 = vsyncpa [#allocation4], 1 }

</bundles_post_ra>
